<compile_context>
chip_gen: v6e
topology: v6e:2x2x1
jax: 0.10.0
libtpu: 0.0.40
codegen_flags: <defaults>
</compile_context>

<pallas_src>
import jax
import jax.numpy as jnp
from jax import lax
from jax.experimental import pallas as pl
from jax.experimental.pallas import tpu as pltpu

# ------------------------- config (small synthetic sizes) -------------------------
HIDDEN_DIM   = 32     # CONTEXT_HIDDEN_DIM
POOLING_DIM  = 64     # CONTEXT_POOLING_DIM
MLP_HEAD_DIM = 64     # == POOLING_DIM -> union_single_not_match = False (no up_dim)
NUM_OBJ_CLS  = 8      # ROI_BOX_HEAD.NUM_CLASSES
NUM_REL_CLS  = 16     # ROI_RELATION_HEAD.NUM_CLASSES
IN_CHANNELS  = 64     # roi feature dim fed to the context-layer stand-in

FUSE_PAD  = 128                         # merged obj|ctx projection / post_emb width
CTX_OFF   = NUM_OBJ_CLS                 # ctx lanes live at [CTX_OFF, CTX_OFF+HIDDEN)
REL_PAD   = 128                         # rel_dists padded columns (>= NUM_REL_CLS)
FREQ_ROWS = NUM_OBJ_CLS * NUM_OBJ_CLS   # 64 pairwise label combinations

TILE_M    = 1024      # max rows per grid step (raised per review; VMEM stays tiny)
ROW_ALIGN = 16        # bf16-friendly sublane multiple


def _round_up(n, m):
    return ((n + m - 1) // m) * m


def _tile_and_pad(n):
    """Row tiling: <= TILE_M rows per tile, and >= 2 grid steps whenever possible
    so both v7x TensorCores get work under dimension_semantics=("parallel",)."""
    n_aligned = _round_up(max(int(n), ROW_ALIGN), ROW_ALIGN)
    if n_aligned >= 2 * ROW_ALIGN:
        half = _round_up(n_aligned // 2, ROW_ALIGN)
        tile = min(TILE_M, half)
    else:
        tile = n_aligned
    n_pad = _round_up(n_aligned, tile)
    return n_pad, tile


def _pad_rows(x, target_rows):
    n = x.shape[0]
    if n == target_rows:
        return x
    pad = [(0, target_rows - n)] + [(0, 0)] * (x.ndim - 1)
    return jnp.pad(x, pad)


def _row_spec(shape, steps):
    """Streamed row-tile spec; 3-deep buffering hides DMA issue latency on v5e."""
    if steps >= 3:
        return pl.BlockSpec(shape, lambda i: (i, 0), pipeline_mode=pl.Buffered(3))
    return pl.BlockSpec(shape, lambda i: (i, 0))


def _const_spec(shape):
    return pl.BlockSpec(shape, lambda i: (0, 0))


# ------------------------- Pallas kernels -------------------------
def _obj_edge_kernel(roi_ref, w_fused_ref, b_fused_ref, w_pe_ref, b_pe_ref,
                     w_ch_ref, w_ct_ref,
                     obj_ref, pred_ref, hc_ref, tc_ref):
    """Fused per-object stage:
         fused      = roi @ [Wobj | Wctx] + b                   (single MXU pass)
         obj_dists  = fused[:, :NUM_OBJ_CLS]                    (8 valid lanes only)
         obj_preds  = argmax(fused[:, 1:NUM_OBJ_CLS]) (in-kernel, max/min formulation)
         edge_rep   = relu(tanh(fused) @ Wpost_emb + b)         (zero weight rows
                                                                 make full-width tanh exact)
         head/tail_contrib = edge_rep @ Wcat_head / Wcat_tail   (per-object post_cat)
    """
    roi = roi_ref[...]                                                       # (T, IN) bf16
    fused = jnp.dot(roi, w_fused_ref[...],
                    preferred_element_type=jnp.float32) + b_fused_ref[...]   # (T,128) f32

    # object logits: only the valid lanes are written back to HBM
    obj_ref[...] = fused[:, :NUM_OBJ_CLS]

    # in-kernel argmax over foreground classes [1, NUM_OBJ_CLS)
    t = roi.shape[0]
    lane = lax.broadcasted_iota(jnp.int32, (t, FUSE_PAD), 1)
    valid = jnp.logical_and(lane >= 1, lane < NUM_OBJ_CLS)
    masked = jnp.where(valid, fused, -1e30)
    row_max = jnp.max(masked, axis=1, keepdims=True)
    sel = jnp.where(masked == row_max, lane.astype(jnp.float32), float(FUSE_PAD))
    pred_ref[...] = jnp.min(sel, axis=1, keepdims=True).astype(jnp.int32)

    # edge_ctx (tanh) -> post_emb -> relu; padded weight rows/cols are zero so the
    # full-128-lane tanh is exact for the real ctx lanes and harmless elsewhere.
    ctx_act = jnp.tanh(fused).astype(jnp.bfloat16)                           # (T,128) bf16
    edge = jnp.dot(ctx_act, w_pe_ref[...],
                   preferred_element_type=jnp.float32) + b_pe_ref[...]       # (T,128) f32
    edge = jnp.maximum(edge, 0.0).astype(jnp.bfloat16)                       # (T,128) bf16

    # per-object post_cat contributions (post_cat bias is added in kernel B)
    hc_ref[...] = jnp.dot(edge, w_ch_ref[...],
                          preferred_element_type=jnp.float32).astype(jnp.bfloat16)
    tc_ref[...] = jnp.dot(edge, w_ct_ref[...],
                          preferred_element_type=jnp.float32).astype(jnp.bfloat16)


def _rel_dists_kernel(hc_ref, tc_ref, union_ref, onehot_ref,
                      b_cat_ref, w_cc_ref, b_cc_ref, table_ref, o_ref):
    """Per-relation stage: (head_contrib + tail_contrib + b)*union -> ctx_compress
       -> + frequency bias (exact f32 gather via one-hot MXU matmul)."""
    x = (hc_ref[...].astype(jnp.float32) + tc_ref[...].astype(jnp.float32)
         + b_cat_ref[...]) * union_ref[...].astype(jnp.float32)              # (T,64) f32
    ctx = jnp.dot(x.astype(jnp.bfloat16), w_cc_ref[...],
                  preferred_element_type=jnp.float32) + b_cc_ref[...]        # (T,128) f32
    # bf16 one-hot is exact 0/1; cast to f32 so the resident f32 table is gathered exactly
    frq = jnp.dot(onehot_ref[...].astype(jnp.float32), table_ref[...],
                  preferred_element_type=jnp.float32)                        # (T,128) f32
    o_ref[...] = ctx + frq


# ------------------------- pallas_call wrappers -------------------------
def obj_edge_forward(roi_features, params):
    n = roi_features.shape[0]
    n_pad, tile = _tile_and_pad(n)
    steps = n_pad // tile
    roi = _pad_rows(roi_features.astype(jnp.bfloat16), n_pad)

    return pl.pallas_call(
        _obj_edge_kernel,
        out_shape=(jax.ShapeDtypeStruct((n_pad, NUM_OBJ_CLS), jnp.float32),
                   jax.ShapeDtypeStruct((n_pad, 1), jnp.int32),
                   jax.ShapeDtypeStruct((n_pad, POOLING_DIM), jnp.bfloat16),
                   jax.ShapeDtypeStruct((n_pad, POOLING_DIM), jnp.bfloat16)),
        grid=(steps,),
        in_specs=[
            _row_spec((tile, IN_CHANNELS), steps),       # roi (streamed)
            _const_spec((IN_CHANNELS, FUSE_PAD)),        # merged [Wobj | Wctx]  (resident)
            _const_spec((1, FUSE_PAD)),                  # merged bias
            _const_spec((FUSE_PAD, FUSE_PAD)),           # w_post_emb (padded)
            _const_spec((1, FUSE_PAD)),                  # b_post_emb
            _const_spec((FUSE_PAD, POOLING_DIM)),        # w_cat_head (padded)
            _const_spec((FUSE_PAD, POOLING_DIM)),        # w_cat_tail (padded)
        ],
        out_specs=(pl.BlockSpec((tile, NUM_OBJ_CLS), lambda i: (i, 0)),
                   pl.BlockSpec((tile, 1), lambda i: (i, 0)),
                   pl.BlockSpec((tile, POOLING_DIM), lambda i: (i, 0)),
                   pl.BlockSpec((tile, POOLING_DIM), lambda i: (i, 0))),
        compiler_params=pltpu.CompilerParams(dimension_semantics=("parallel",)),
    )(roi, params['w_fused'], params['b_fused'],
      params['w_post_emb'], params['b_post_emb'],
      params['w_cat_head'], params['w_cat_tail'])


def rel_dists_forward(head_rows, tail_rows, union_bf16, onehot, params):
    n = head_rows.shape[0]
    n_pad, tile = _tile_and_pad(n)
    steps = n_pad // tile
    head = _pad_rows(head_rows, n_pad)
    tail = _pad_rows(tail_rows, n_pad)
    union = _pad_rows(union_bf16, n_pad)
    oneh = _pad_rows(onehot, n_pad)

    return pl.pallas_call(
        _rel_dists_kernel,
        out_shape=jax.ShapeDtypeStruct((n_pad, REL_PAD), jnp.float32),
        grid=(steps,),
        in_specs=[
            _row_spec((tile, POOLING_DIM), steps),       # head contributions (streamed)
            _row_spec((tile, POOLING_DIM), steps),       # tail contributions
            _row_spec((tile, POOLING_DIM), steps),       # union features (bf16)
            _row_spec((tile, FREQ_ROWS), steps),         # pairwise one-hot (bf16)
            _const_spec((1, POOLING_DIM)),               # b_post_cat          (resident)
            _const_spec((POOLING_DIM, REL_PAD)),         # w_ctx_compress
            _const_spec((1, REL_PAD)),                   # b_ctx_compress
            _const_spec((FREQ_ROWS, REL_PAD)),           # freq bias table (f32, exact)
        ],
        out_specs=pl.BlockSpec((tile, REL_PAD), lambda i: (i, 0)),
        compiler_params=pltpu.CompilerParams(dimension_semantics=("parallel",)),
    )(head, tail, union, oneh,
      params['b_post_cat'], params['w_ctx_compress'], params['b_ctx_compress'],
      params['freq_bias'])


# ------------------------- parameter construction -------------------------
def make_params(key):
    ks = jax.random.split(key, 6)

    def xavier(k, fi, fo):
        return jax.random.normal(k, (fi, fo), jnp.float32) * (2.0 / (fi + fo)) ** 0.5

    w_obj  = xavier(ks[0], IN_CHANNELS, NUM_OBJ_CLS)
    w_ctxp = xavier(ks[1], IN_CHANNELS, HIDDEN_DIM)
    # post_emb: normal init with std = 10 * (1/hidden)**0.5
    w_pe   = jax.random.normal(ks[2], (HIDDEN_DIM, 2 * HIDDEN_DIM), jnp.float32) \
        * (10.0 * (1.0 / HIDDEN_DIM) ** 0.5)
    w_cat  = xavier(ks[3], 2 * HIDDEN_DIM, POOLING_DIM)
    w_cc   = xavier(ks[4], POOLING_DIM, NUM_REL_CLS)
    freq   = jax.random.normal(ks[5], (FREQ_ROWS, NUM_REL_CLS), jnp.float32) * 0.1

    # merged obj|ctx projection: cols [0:8) = w_obj, cols [8:40) = w_ctx_proj
    w_fused = jnp.zeros((IN_CHANNELS, FUSE_PAD), jnp.float32)
    w_fused = w_fused.at[:, :NUM_OBJ_CLS].set(w_obj)
    w_fused = w_fused.at[:, CTX_OFF:CTX_OFF + HIDDEN_DIM].set(w_ctxp)

    # post_emb padded: only rows [8:40) (the ctx lanes) are non-zero
    w_pe_pad = jnp.zeros((FUSE_PAD, FUSE_PAD), jnp.float32)
    w_pe_pad = w_pe_pad.at[CTX_OFF:CTX_OFF + HIDDEN_DIM, :2 * HIDDEN_DIM].set(w_pe)

    # post_cat split: head half consumes edge_rep cols [0:32), tail half cols [32:64)
    w_cat_head = jnp.zeros((FUSE_PAD, POOLING_DIM), jnp.float32)
    w_cat_head = w_cat_head.at[:HIDDEN_DIM].set(w_cat[:HIDDEN_DIM])
    w_cat_tail = jnp.zeros((FUSE_PAD, POOLING_DIM), jnp.float32)
    w_cat_tail = w_cat_tail.at[HIDDEN_DIM:2 * HIDDEN_DIM].set(w_cat[HIDDEN_DIM:])

    w_cc_pad = jnp.zeros((POOLING_DIM, REL_PAD), jnp.float32).at[:, :NUM_REL_CLS].set(w_cc)
    freq_pad = jnp.zeros((FREQ_ROWS, REL_PAD), jnp.float32).at[:, :NUM_REL_CLS].set(freq)

    return {
        'w_fused': w_fused.astype(jnp.bfloat16),
        'b_fused': jnp.zeros((1, FUSE_PAD), jnp.float32),
        'w_post_emb': w_pe_pad.astype(jnp.bfloat16),
        'b_post_emb': jnp.zeros((1, FUSE_PAD), jnp.float32),
        'w_cat_head': w_cat_head.astype(jnp.bfloat16),
        'w_cat_tail': w_cat_tail.astype(jnp.bfloat16),
        'b_post_cat': jnp.zeros((1, POOLING_DIM), jnp.float32),
        'w_ctx_compress': w_cc_pad.astype(jnp.bfloat16),
        'b_ctx_compress': jnp.zeros((1, REL_PAD), jnp.float32),
        'freq_bias': freq_pad,   # f32 table -> exact one-hot gather
    }


# ------------------------- forward -------------------------
def vctree_predictor_forward(params, num_objs, rel_pair_idxs, roi_features, union_features):
    num_rels = [int(r.shape[0]) for r in rel_pair_idxs]
    assert len(num_rels) == len(num_objs)
    n_obj = int(roi_features.shape[0])
    n_rel = sum(num_rels)

    # kernel A: context stand-in + post_emb + per-object post_cat halves + argmax
    obj_pad, pred_pad, headc_pad, tailc_pad = obj_edge_forward(roi_features, params)
    obj_dists = obj_pad[:n_obj]                         # (n_obj, NUM_OBJ_CLS) f32
    obj_preds = pred_pad[:n_obj, 0]                     # (n_obj,) int32

    # globally-offset pair indices (offsets are static Python ints)
    offsets, acc = [], 0
    for n in num_objs:
        offsets.append(acc)
        acc += n
    pair_global = jnp.concatenate(
        [p.astype(jnp.int32) + off for p, off in zip(rel_pair_idxs, offsets)], axis=0)
    head_idx = pair_global[:, 0]
    tail_idx = pair_global[:, 1]

    # gather the 64-lane bf16 per-object contributions (half the bytes of 128-lane rows)
    head_rows = jnp.take(headc_pad, head_idx, axis=0)
    tail_rows = jnp.take(tailc_pad, tail_idx, axis=0)

    # pairwise frequency-bias index -> lane-dense bf16 one-hot (exact 0/1)
    freq_idx = (jnp.take(obj_preds, head_idx) * NUM_OBJ_CLS
                + jnp.take(obj_preds, tail_idx))
    onehot = jax.nn.one_hot(freq_idx, FREQ_ROWS, dtype=jnp.bfloat16)

    # union_single_not_match == False (POOLING_DIM == MLP_HEAD_DIM) -> no up_dim
    union_bf16 = union_features.astype(jnp.bfloat16)

    rel_pad_out = rel_dists_forward(head_rows, tail_rows, union_bf16, onehot, params)
    rel_dists = rel_pad_out[:n_rel, :NUM_REL_CLS]

    # split outputs per image
    obj_dists_split, off = [], 0
    for n in num_objs:
        obj_dists_split.append(obj_dists[off:off + n]); off += n
    rel_dists_split, off = [], 0
    for n in num_rels:
        rel_dists_split.append(rel_dists[off:off + n]); off += n

    add_losses = {}   # inference path (self.training == False)
    return obj_dists_split, rel_dists_split, add_losses


# ------------------------- demo -------------------------
if __name__ == "__main__":
    key = jax.random.PRNGKey(0)
    k_par, k_roi, k_uni, k_p1, k_p2 = jax.random.split(key, 5)

    params = make_params(k_par)

    num_objs = [5, 4]                       # "proposals" (2 images)
    n_obj_total = sum(num_objs)
    rel_pair_idxs = [
        jax.random.randint(k_p1, (6, 2), 0, num_objs[0], dtype=jnp.int32),
        jax.random.randint(k_p2, (4, 2), 0, num_objs[1], dtype=jnp.int32),
    ]
    n_rel_total = sum(int(r.shape[0]) for r in rel_pair_idxs)

    roi_features = jax.random.normal(k_roi, (n_obj_total, IN_CHANNELS), jnp.float32)
    union_features = jax.random.normal(k_uni, (n_rel_total, POOLING_DIM), jnp.float32)

    obj_dists, rel_dists, add_losses = vctree_predictor_forward(
        params, num_objs, rel_pair_idxs, roi_features, union_features)

    for t in obj_dists + rel_dists:
        jax.block_until_ready(t)

    assert obj_dists[0].shape == (5, NUM_OBJ_CLS)
    assert obj_dists[1].shape == (4, NUM_OBJ_CLS)
    assert rel_dists[0].shape == (6, NUM_REL_CLS)
    assert rel_dists[1].shape == (4, NUM_REL_CLS)
    assert all(bool(jnp.all(jnp.isfinite(t))) for t in obj_dists + rel_dists)
    print("KERNEL_OK")
</pallas_src>

<mosaic_0001>
module attributes {stable_mosaic.version = 11 : i64} {
  func.func @_obj_edge_kernel(%arg0: i32, %arg1: memref<16x64xbf16, #tpu.memory_space<vmem>>, %arg2: memref<64x128xbf16, #tpu.memory_space<vmem>>, %arg3: memref<1x128xf32, #tpu.memory_space<vmem>>, %arg4: memref<128x128xbf16, #tpu.memory_space<vmem>>, %arg5: memref<1x128xf32, #tpu.memory_space<vmem>>, %arg6: memref<128x64xbf16, #tpu.memory_space<vmem>>, %arg7: memref<128x64xbf16, #tpu.memory_space<vmem>>, %arg8: memref<16x8xf32, #tpu.memory_space<vmem>>, %arg9: memref<16x1xi32, #tpu.memory_space<vmem>>, %arg10: memref<16x64xbf16, #tpu.memory_space<vmem>>, %arg11: memref<16x64xbf16, #tpu.memory_space<vmem>>) attributes {dimension_semantics = [#tpu.dimension_semantics<parallel>], iteration_bounds = array<i64: 1>, scalar_prefetch = 0 : i64, scratch_operands = 0 : i64, tpu.core_type = #tpu.core_type<tc>, window_params = [{transform_indices = @transform_0, window_bounds = array<i64: 16, 64>}, {pipeline_mode = #tpu.pipeline_mode<synchronous>, transform_indices = @transform_1, window_bounds = array<i64: 64, 128>}, {pipeline_mode = #tpu.pipeline_mode<synchronous>, transform_indices = @transform_2, window_bounds = array<i64: 1, 128>}, {pipeline_mode = #tpu.pipeline_mode<synchronous>, transform_indices = @transform_3, window_bounds = array<i64: 128, 128>}, {pipeline_mode = #tpu.pipeline_mode<synchronous>, transform_indices = @transform_4, window_bounds = array<i64: 1, 128>}, {pipeline_mode = #tpu.pipeline_mode<synchronous>, transform_indices = @transform_5, window_bounds = array<i64: 128, 64>}, {pipeline_mode = #tpu.pipeline_mode<synchronous>, transform_indices = @transform_6, window_bounds = array<i64: 128, 64>}, {transform_indices = @transform_7, window_bounds = array<i64: 16, 8>}, {transform_indices = @transform_8, window_bounds = array<i64: 16, 1>}, {transform_indices = @transform_9, window_bounds = array<i64: 16, 64>}, {transform_indices = @transform_10, window_bounds = array<i64: 16, 64>}]} {
    %c0 = arith.constant 0 : index
    %c0_0 = arith.constant 0 : index
    %0 = vector.load %arg1[%c0, %c0_0] : memref<16x64xbf16, #tpu.memory_space<vmem>>, vector<16x64xbf16>
    %c0_1 = arith.constant 0 : index
    %c0_2 = arith.constant 0 : index
    %1 = vector.load %arg2[%c0_1, %c0_2] : memref<64x128xbf16, #tpu.memory_space<vmem>>, vector<64x128xbf16>
    %cst = arith.constant dense<0.000000e+00> : vector<16x128xf32>
    %2 = tpu.matmul %0, %1, %cst {dimension_numbers = #tpu.dot_dimension_numbers<[1], [0], [0], [1], [0, 0, 1, 1], [], []>} : vector<16x64xbf16>, vector<64x128xbf16>, vector<16x128xf32> -> vector<16x128xf32>
    %c0_3 = arith.constant 0 : index
    %c0_4 = arith.constant 0 : index
    %3 = vector.load %arg3[%c0_3, %c0_4] : memref<1x128xf32, #tpu.memory_space<vmem>>, vector<1x128xf32>
    %4 = vector.broadcast %3 : vector<1x128xf32> to vector<16x128xf32>
    %5 = arith.addf %2, %4 : vector<16x128xf32>
    %6 = vector.extract_strided_slice %5 {offsets = [0, 0], sizes = [16, 8], strides = [1, 1]} : vector<16x128xf32> to vector<16x8xf32>
    %c0_5 = arith.constant 0 : index
    %c0_6 = arith.constant 0 : index
    %7 = vector.load %arg8[%c0_5, %c0_6] : memref<16x8xf32, #tpu.memory_space<vmem>>, vector<16x8xf32>
    tpu.vector_store %arg8[%c0_5, %c0_6], %6 {strides = array<i32>} : memref<16x8xf32, #tpu.memory_space<vmem>>, vector<16x8xf32>,
    %8 = tpu.iota {dimensions = array<i32: 1>} : vector<16x128xi32>
    %c1_i32 = arith.constant 1 : i32
    %9 = vector.broadcast %c1_i32 : i32 to vector<16x128xi32>
    %10 = arith.cmpi sge, %8, %9 : vector<16x128xi32>
    %c8_i32 = arith.constant 8 : i32
    %11 = vector.broadcast %c8_i32 : i32 to vector<16x128xi32>
    %12 = arith.cmpi slt, %8, %11 : vector<16x128xi32>
    %13 = arith.andi %10, %12 : vector<16x128xi1>
    %cst_7 = arith.constant -1.000000e+30 : f32
    %14 = vector.broadcast %cst_7 : f32 to vector<16x128xf32>
    %15 = arith.select %13, %5, %14 : vector<16x128xi1>, vector<16x128xf32>
    %cst_8 = arith.constant dense<0xFF800000> : vector<16xf32>
    %16 = vector.multi_reduction <maximumf>, %15, %cst_8 [1] : vector<16x128xf32> to vector<16xf32>
    %17 = vector.shape_cast %16 : vector<16xf32> to vector<16x1xf32>
    %18 = vector.broadcast %17 : vector<16x1xf32> to vector<16x128xf32>
    %19 = arith.cmpf oeq, %15, %18 : vector<16x128xf32>
    %20 = arith.sitofp %8 : vector<16x128xi32> to vector<16x128xf32>
    %cst_9 = arith.constant 1.280000e+02 : f32
    %21 = vector.broadcast %cst_9 : f32 to vector<16x128xf32>
    %22 = arith.select %19, %20, %21 : vector<16x128xi1>, vector<16x128xf32>
    %cst_10 = arith.constant dense<0x7F800000> : vector<16xf32>
    %23 = vector.multi_reduction <minimumf>, %22, %cst_10 [1] : vector<16x128xf32> to vector<16xf32>
    %24 = vector.shape_cast %23 : vector<16xf32> to vector<16x1xf32>
    %25 = arith.fptosi %24 : vector<16x1xf32> to vector<16x1xi32>
    %c0_11 = arith.constant 0 : index
    %c0_12 = arith.constant 0 : index
    %26 = vector.load %arg9[%c0_11, %c0_12] : memref<16x1xi32, #tpu.memory_space<vmem>>, vector<16x1xi32>
    tpu.vector_store %arg9[%c0_11, %c0_12], %25 {strides = array<i32>} : memref<16x1xi32, #tpu.memory_space<vmem>>, vector<16x1xi32>,
    %27 = math.tanh %5 : vector<16x128xf32>
    %28 = arith.truncf %27 : vector<16x128xf32> to vector<16x128xbf16>
    %c0_13 = arith.constant 0 : index
    %c0_14 = arith.constant 0 : index
    %29 = vector.load %arg4[%c0_13, %c0_14] : memref<128x128xbf16, #tpu.memory_space<vmem>>, vector<128x128xbf16>
    %cst_15 = arith.constant dense<0.000000e+00> : vector<16x128xf32>
    %30 = tpu.matmul %28, %29, %cst_15 {dimension_numbers = #tpu.dot_dimension_numbers<[1], [0], [0], [1], [0, 0, 1, 1], [], []>} : vector<16x128xbf16>, vector<128x128xbf16>, vector<16x128xf32> -> vector<16x128xf32>
    %c0_16 = arith.constant 0 : index
    %c0_17 = arith.constant 0 : index
    %31 = vector.load %arg5[%c0_16, %c0_17] : memref<1x128xf32, #tpu.memory_space<vmem>>, vector<1x128xf32>
    %32 = vector.broadcast %31 : vector<1x128xf32> to vector<16x128xf32>
    %33 = arith.addf %30, %32 : vector<16x128xf32>
    %cst_18 = arith.constant 0.000000e+00 : f32
    %34 = vector.broadcast %cst_18 : f32 to vector<16x128xf32>
    %35 = arith.maximumf %33, %34 : vector<16x128xf32>
    %36 = arith.truncf %35 : vector<16x128xf32> to vector<16x128xbf16>
    %c0_19 = arith.constant 0 : index
    %c0_20 = arith.constant 0 : index
    %37 = vector.load %arg6[%c0_19, %c0_20] : memref<128x64xbf16, #tpu.memory_space<vmem>>, vector<128x64xbf16>
    %cst_21 = arith.constant dense<0.000000e+00> : vector<16x64xf32>
    %38 = tpu.matmul %36, %37, %cst_21 {dimension_numbers = #tpu.dot_dimension_numbers<[1], [0], [0], [1], [0, 0, 1, 1], [], []>} : vector<16x128xbf16>, vector<128x64xbf16>, vector<16x64xf32> -> vector<16x64xf32>
    %39 = arith.truncf %38 : vector<16x64xf32> to vector<16x64xbf16>
    %c0_22 = arith.constant 0 : index
    %c0_23 = arith.constant 0 : index
    %40 = vector.load %arg10[%c0_22, %c0_23] : memref<16x64xbf16, #tpu.memory_space<vmem>>, vector<16x64xbf16>
    tpu.vector_store %arg10[%c0_22, %c0_23], %39 {strides = array<i32>} : memref<16x64xbf16, #tpu.memory_space<vmem>>, vector<16x64xbf16>,
    %c0_24 = arith.constant 0 : index
    %c0_25 = arith.constant 0 : index
    %41 = vector.load %arg7[%c0_24, %c0_25] : memref<128x64xbf16, #tpu.memory_space<vmem>>, vector<128x64xbf16>
    %cst_26 = arith.constant dense<0.000000e+00> : vector<16x64xf32>
    %42 = tpu.matmul %36, %41, %cst_26 {dimension_numbers = #tpu.dot_dimension_numbers<[1], [0], [0], [1], [0, 0, 1, 1], [], []>} : vector<16x128xbf16>, vector<128x64xbf16>, vector<16x64xf32> -> vector<16x64xf32>
    %43 = arith.truncf %42 : vector<16x64xf32> to vector<16x64xbf16>
    %c0_27 = arith.constant 0 : index
    %c0_28 = arith.constant 0 : index
    %44 = vector.load %arg11[%c0_27, %c0_28] : memref<16x64xbf16, #tpu.memory_space<vmem>>, vector<16x64xbf16>
    tpu.vector_store %arg11[%c0_27, %c0_28], %43 {strides = array<i32>} : memref<16x64xbf16, #tpu.memory_space<vmem>>, vector<16x64xbf16>,
    return
  }
  func.func @transform_0(%arg0: i32) -> (i32, i32) {
    %c0_i32 = arith.constant 0 : i32
    %c0_i32_0 = arith.constant 0 : i32
    return %arg0, %c0_i32 : i32, i32
  }
  func.func @transform_1(%arg0: i32) -> (i32, i32) {
    %c0_i32 = arith.constant 0 : i32
    %c0_i32_0 = arith.constant 0 : i32
    %c0_i32_1 = arith.constant 0 : i32
    return %c0_i32, %c0_i32_0 : i32, i32
  }
  func.func @transform_2(%arg0: i32) -> (i32, i32) {
    %c0_i32 = arith.constant 0 : i32
    %c0_i32_0 = arith.constant 0 : i32
    %c0_i32_1 = arith.constant 0 : i32
    return %c0_i32, %c0_i32_0 : i32, i32
  }
  func.func @transform_3(%arg0: i32) -> (i32, i32) {
    %c0_i32 = arith.constant 0 : i32
    %c0_i32_0 = arith.constant 0 : i32
    %c0_i32_1 = arith.constant 0 : i32
    return %c0_i32, %c0_i32_0 : i32, i32
  }
  func.func @transform_4(%arg0: i32) -> (i32, i32) {
    %c0_i32 = arith.constant 0 : i32
    %c0_i32_0 = arith.constant 0 : i32
    %c0_i32_1 = arith.constant 0 : i32
    return %c0_i32, %c0_i32_0 : i32, i32
  }
  func.func @transform_5(%arg0: i32) -> (i32, i32) {
    %c0_i32 = arith.constant 0 : i32
    %c0_i32_0 = arith.constant 0 : i32
    %c0_i32_1 = arith.constant 0 : i32
    return %c0_i32, %c0_i32_0 : i32, i32
  }
  func.func @transform_6(%arg0: i32) -> (i32, i32) {
    %c0_i32 = arith.constant 0 : i32
    %c0_i32_0 = arith.constant 0 : i32
    %c0_i32_1 = arith.constant 0 : i32
    return %c0_i32, %c0_i32_0 : i32, i32
  }
  func.func @transform_7(%arg0: i32) -> (i32, i32) {
    %c0_i32 = arith.constant 0 : i32
    %c0_i32_0 = arith.constant 0 : i32
    return %arg0, %c0_i32 : i32, i32
  }
  func.func @transform_8(%arg0: i32) -> (i32, i32) {
    %c0_i32 = arith.constant 0 : i32
    %c0_i32_0 = arith.constant 0 : i32
    return %arg0, %c0_i32 : i32, i32
  }
  func.func @transform_9(%arg0: i32) -> (i32, i32) {
    %c0_i32 = arith.constant 0 : i32
    %c0_i32_0 = arith.constant 0 : i32
    return %arg0, %c0_i32 : i32, i32
  }
  func.func @transform_10(%arg0: i32) -> (i32, i32) {
    %c0_i32 = arith.constant 0 : i32
    %c0_i32_0 = arith.constant 0 : i32
    return %arg0, %c0_i32 : i32, i32
  }
}

</mosaic_0001>

<bundles_post_ra>
// kernel: tpu_custom_call.1
= control target key start
LH: loop header
LB: loop body
LE: loop exit
PB: predicated region body
PF: predicated region fallthrough
CT: control target
= control target key end

     0   :  { %16 = vsyncpa [#allocation3], 0  ;;  %v772_v1 = vmov 0.0   ;;  %vm773_vm0 = vmmov 0   ;;  %vm79_vm1 = vcmask 523264   ;;  %s993_s0 = inlined_call_operand.vmem [shape: bf16[16,64], index: 0, kind: input, shape index: {}]   ;;  %s994_s1 = inlined_call_operand.vmem [shape: bf16[64,128], index: 1, kind: input, shape index: {}]   ;;  %s995_s2 = inlined_call_operand.vmem [shape: f32[1,128], index: 2, kind: input, shape index: {}]   ;;  %s996_s3 = inlined_call_operand.vmem [shape: bf16[128,128], index: 3, kind: input, shape index: {}]   ;;  %s997_s4 = inlined_call_operand.vmem [shape: f32[1,128], index: 4, kind: input, shape index: {}]   ;;  %s998_s5 = inlined_call_operand.vmem [shape: bf16[128,64], index: 5, kind: input, shape index: {}]   ;;  %s999_s6 = inlined_call_operand.vmem [shape: bf16[128,64], index: 6, kind: input, shape index: {}]   ;;  %s1000_s7 = inlined_call_operand.vmem [shape: f32[16,8], index: 7, kind: output, shape index: {0}]   ;;  %s1001_s8 = inlined_call_operand.vmem [shape: s32[16,1], index: 8, kind: output, shape index: {1}]   ;;  %s1002_s9 = inlined_call_operand.hbm [shape: bf16[16,64], index: 9, kind: output, shape index: {2}]   ;;  %s1003_s10 = inlined_call_operand.hbm [shape: bf16[16,64], index: 10, kind: output, shape index: {3}]  }
   0x1   :  { %v695_v0 = vld [vmem:[%s994_s1 + $0x18] sm:$0xff]   ;;  %613 = vmatprep.subr.bf16.mxu0 %v772_v1  ;;  %625 = vmatprep.subr.bf16.mxu1 %v772_v1  ;;  %v696_v2 = vld [vmem:[%s994_s1 + $0x10] sm:$0xff]   ;;  %v697_v4 = vld [vmem:[%s994_s1 + $0x8] sm:$0xff]  }
   0x2   :  { %614 = vmatpush3.bf16.msra.mxu0 %v695_v0  ;;  %621 = vmatprep.mubr.msk.bf16.mxu0 %vm773_vm0, %v772_v1  ;;  %v700_v3 = vld [vmem:[%s996_s3 + $0x38] sm:$0xff]   ;;  %v701_v5 = vld [vmem:[%s996_s3 + $0x30] sm:$0xff]   ;;  %v698_v6 = vld [vmem:[%s994_s1] sm:$0xff]  }
   0x3   :  { %615 = vmatprep.subr.bf16.mxu0 %v772_v1  ;;  %641 = vmatprep.mubr.msk.bf16.mxu1 %vm773_vm0, %v772_v1  ;;  %v699_v7 = vld [vmem:[%s993_s0] sm:$0xff]  }
   0x4   :  { %626 = vmatpush3.bf16.msra.mxu1 %v700_v3 }
   0x5   :  { %627 = vmatprep.subr.bf16.mxu1 %v772_v1 }
   0x6   :  { %616 = vmatpush3.bf16.msra.mxu0 %v696_v2 }
   0x7   :  { %617 = vmatprep.subr.bf16.mxu0 %v772_v1 }
   0x8   :  { %628 = vmatpush3.bf16.msra.mxu1 %v701_v5 }
   0x9   :  { %629 = vmatprep.subr.bf16.mxu1 %v772_v1 }
   0xa   :  { %618 = vmatpush3.bf16.msra.mxu0 %v697_v4 }
   0xb   :  { %619 = vmatprep.subr.bf16.mxu0 %v772_v1 }
   0xe   :  { %620 = vmatpush3.bf16.msra.mxu0 %v698_v6 }
   0xf   :  { %645 = vmatprep.subr.bf16.mxu0 %v772_v1 }
  0x11   :  { %622 = vmatmul.mubr.msk.bf16.vlgmr.msra.gmra.mxu0 %vm79_vm1, %v699_v7 }
  0x12   :  { %661 = vmatprep.mubr.msk.bf16.mxu0 %vm773_vm0, %v772_v1 }
  0x13   :  { %17 = vsyncpa [#allocation5], 0  ;;  %v702_v8 = vld [vmem:[%s996_s3 + $0x28] sm:$0xff]   ;;  %v703_v9 = vld [vmem:[%s996_s3 + $0x20] sm:$0xff]   ;;  %v127_v14 = vlaneseq  ;;  %vm124_vm4 = vcmask 64512   ;;  %vm149_vm8 = vcmask 7168  }
  0x14   :  { %630 = vmatpush3.bf16.msra.mxu1 %v702_v8  ;;  %v704_v10 = vld [vmem:[%s996_s3 + $0x18] sm:$0xff]   ;;  %v705_v11 = vld [vmem:[%s996_s3 + $0x10] sm:$0xff]   ;;  %v706_v12 = vld [vmem:[%s996_s3 + $0x8] sm:$0xff]   ;;  %vm383_vm9 = vcmask 519168   ;;  %s774_s0 = smov [#allocation2]   ;;  %s775_s30 = smov [#allocation4]  }
  0x15   :  { %631 = vmatprep.subr.bf16.mxu1 %v772_v1  ;;  %v707_v13 = vld [vmem:[%s996_s3] sm:$0xff]   ;;  %v892_v15 = vand.u32 127, %v127_v14  ;;  %v708_v27 = vld [vmem:[%s998_s5 + $0x38] sm:$0xff]   ;;  %v710_v30 = vld [vmem:[%s998_s5 + $0x30] sm:$0xff]   ;;  %s510_s29 = sshll.u32 %s774_s0, 4  ;;  %s522_s11 = sshll.u32 %s775_s30, 4  ;;  %s511_s29 = int_to_ptr.vmem [resolvable:$true] %s510_s29  ;;  %s523_s11 = int_to_ptr.vmem [resolvable:$true] %s522_s11 }
  0x16   :  { %v541_v16 = vld [vmem:[%s995_s2] ss:$0 sm:$0xff]  ;;  %v709_v28 = vld [vmem:[%s999_s6 + $0x38] sm:$0xff]   ;;  %646 = vmatpush3.bf16.msra.mxu0 %v708_v27  ;;  %v711_v31 = vld [vmem:[%s999_s6 + $0x30] sm:$0xff]   ;;  %p733_p1 = scmp.lt.s32.totalorder %s511_s29, %s511_s29 }
  0x17   :  { %vm129_vm2 = vcmp.ge.s32.totalorder %v892_v15, 1  ;;  %vm130_vm3 = vcmp.lt.s32.totalorder %v892_v15, 8  ;;  %647 = vmatprep.subr.bf16.mxu0 %v772_v1  ;;  %v712_v32 = vld [vmem:[%s998_s5 + $0x28] sm:$0xff]   ;;  %v714_v34 = vld [vmem:[%s998_s5 + $0x20] sm:$0xff]   ;;  %v716_v36 = vld [vmem:[%s998_s5 + $0x18] sm:$0xff]   ;;  %v140_v44 = vcvt.s32.f32 %v892_v15 }
  0x18   :  { %632 = vmatpush3.bf16.msra.mxu1 %v703_v9  ;;  %vm131_vm5 = vmand %vm129_vm2, %vm130_vm3  ;;  %v713_v33 = vld [vmem:[%s999_s6 + $0x28] sm:$0xff]   ;;  %v715_v35 = vld [vmem:[%s999_s6 + $0x20] sm:$0xff]  }
  0x19   :  { %633 = vmatprep.subr.bf16.mxu1 %v772_v1  ;;  %v717_v37 = vld [vmem:[%s999_s6 + $0x18] sm:$0xff]   ;;  %v718_v38 = vld [vmem:[%s998_s5 + $0x10] sm:$0xff]   ;;  %v720_v40 = vld [vmem:[%s998_s5 + $0x8] sm:$0xff]  }
  0x1a   :  { %648 = vmatpush3.bf16.msra.mxu0 %v710_v30  ;;  %v719_v39 = vld [vmem:[%s999_s6 + $0x10] sm:$0xff]   ;;  %v721_v41 = vld [vmem:[%s999_s6 + $0x8] sm:$0xff]   ;;  %v722_v42 = vld [vmem:[%s998_s5] sm:$0xff]  }
  0x1b   :  { %649 = vmatprep.subr.bf16.mxu0 %v772_v1  ;;  %v723_v43 = vld [vmem:[%s999_s6] sm:$0xff]  }
  0x1c   :  { %634 = vmatpush3.bf16.msra.mxu1 %v704_v10  ;;  %v548_v49 = vld [vmem:[%s997_s4] ss:$0 sm:$0xff] }
  0x1d   :  { %635 = vmatprep.subr.bf16.mxu1 %v772_v1 }
  0x1e   :  { %650 = vmatpush3.bf16.msra.mxu0 %v712_v32 }
  0x1f   :  { %651 = vmatprep.subr.bf16.mxu0 %v772_v1 }
  0x20   :  { %636 = vmatpush3.bf16.msra.mxu1 %v705_v11 }
  0x21   :  { %637 = vmatprep.subr.bf16.mxu1 %v772_v1 }
  0x22   :  { %652 = vmatpush3.bf16.msra.mxu0 %v714_v34 }
  0x23   :  { %653 = vmatprep.subr.bf16.mxu0 %v772_v1 }
  0x24   :  { %638 = vmatpush3.bf16.msra.mxu1 %v706_v12 }
  0x25   :  { %639 = vmatprep.subr.bf16.mxu1 %v772_v1 }
  0x26   :  { %654 = vmatpush3.bf16.msra.mxu0 %v716_v36 }
  0x27   :  { %655 = vmatprep.subr.bf16.mxu0 %v772_v1 }
  0x28   :  { %640 = vmatpush3.bf16.msra.mxu1 %v707_v13 }
  0x29   :  { %665 = vmatprep.subr.bf16.mxu1 %v772_v1 }
  0x2a   :  { %656 = vmatpush3.bf16.msra.mxu0 %v718_v38 }
  0x2b   :  { %657 = vmatprep.subr.bf16.mxu0 %v772_v1 }
  0x2e   :  { %658 = vmatpush3.bf16.msra.mxu0 %v720_v40 }
  0x2f   :  { %659 = vmatprep.subr.bf16.mxu0 %v772_v1 }
  0x32   :  { %660 = vmatpush3.bf16.msra.mxu0 %v722_v42 }
  0xd1   :  { %v117_v17 = vpop.f32.mrf.mxu0 }
  0xd2   :  { %v118_v18 = vadd.f32 %v541_v16, %v117_v17 }
  0xd3   :  { %v623_v19 = vpop.f32.mrf.mxu0 }
  0xd4   :  { %125 = vst.msk [vmem:[%s1000_s7] sm:$0xff] %vm124_vm4, %v118_v18  ;;  %v902_v20 = vsel %vm131_vm5, %v118_v18, -1e+30  ;;  %724 = vtanh.f32 %v118_v18 }
  0xd5   :  { %134 = vmax.xlane.f32.xlu0 %v902_v20  ;;  %v120_v21 = vpop.f32.mrf.mxu0 }
  0xd6   :  { %v121_v22 = vadd.f32 %v541_v16, %v120_v21 }
  0xd7   :  { %v624_v23 = vpop.f32.mrf.mxu0 }
  0xd8   :  { %126 = vst.msk [vmem:[%s1000_s7 + $0x8] sm:$0xff] %vm124_vm4, %v121_v22  ;;  %726 = vtanh.f32 %v121_v22  ;;  %v133_v24 = vsel %vm131_vm5, %v121_v22, -1e+30 }
  0xd9   :  { %136 = vmax.xlane.f32.xlu0 %v133_v24 }
  0xe1   :  { %v725_v25 = vpop.eup %724 }
  0xe5   :  { %v727_v26 = vpop.eup %726 }
  0xe6   :  { %v154_v29 = vpack.c.bf16 %v727_v26, %v725_v25 }
  0xe8   :  { %642 = vmatmul.mubr.bf16.vlgmr.msra.gmra.mxu1 %v154_v29 }
  0xe9   :  { %666 = vmatpush3.bf16.msra.mxu1 %v709_v28  ;;  %681 = vmatprep.mubr.msk.bf16.mxu1 %vm773_vm0, %v772_v1 }
  0xea   :  { %667 = vmatprep.subr.bf16.mxu1 %v772_v1 }
  0xed   :  { %668 = vmatpush3.bf16.msra.mxu1 %v711_v31 }
  0xee   :  { %669 = vmatprep.subr.bf16.mxu1 %v772_v1 }
  0xf1   :  { %670 = vmatpush3.bf16.msra.mxu1 %v713_v33 }
  0xf2   :  { %671 = vmatprep.subr.bf16.mxu1 %v772_v1 }
  0xf5   :  { %672 = vmatpush3.bf16.msra.mxu1 %v715_v35 }
  0xf6   :  { %673 = vmatprep.subr.bf16.mxu1 %v772_v1 }
  0xf9   :  { %674 = vmatpush3.bf16.msra.mxu1 %v717_v37 }
  0xfa   :  { %675 = vmatprep.subr.bf16.mxu1 %v772_v1 }
  0xfd   :  { %676 = vmatpush3.bf16.msra.mxu1 %v719_v39 }
  0xfe   :  { %677 = vmatprep.subr.bf16.mxu1 %v772_v1 }
 0x101   :  { %678 = vmatpush3.bf16.msra.mxu1 %v721_v41 }
 0x102   :  { %679 = vmatprep.subr.bf16.mxu1 %v772_v1 }
 0x105   :  { %680 = vmatpush3.bf16.msra.mxu1 %v723_v43 }
 0x15e   :  { %v135_v45 = vpop.xlane.xlu0 %134 }
 0x15f   :  { %vm138_vm6 = vcmp.eq.f32.partialorder %v902_v20, %v135_v45 }
 0x160   :  { %v141_v46 = vsel %vm138_vm6, %v140_v44, 128.0 }
 0x161   :  { %143 = vmin.xlane.f32.xlu1 %v141_v46 }
 0x162   :  { %v137_v47 = vpop.xlane.xlu0 %136 }
 0x163   :  { %vm139_vm7 = vcmp.eq.f32.partialorder %v133_v24, %v137_v47 }
 0x164   :  { %v142_v48 = vsel %vm139_vm7, %v140_v44, 128.0 }
 0x165   :  { %145 = vmin.xlane.f32.xlu1 %v142_v48 }
 0x1a8   :  { %v260_v50 = vpop.f32.mrf.mxu1 }
 0x1a9   :  { %v261_v52 = vadd.f32 %v548_v49, %v260_v50 }
 0x1aa   :  { %v643_v51 = vpop.f32.mrf.mxu1 }
 0x1ab   :  { %v267_v56 = vmax.f32 %v261_v52, 0.0 }
 0x1ac   :  { %v263_v53 = vpop.f32.mrf.mxu1 }
 0x1ad   :  { %v264_v54 = vadd.f32 %v548_v49, %v263_v53 }
 0x1ae   :  { %v644_v55 = vpop.f32.mrf.mxu1 }
 0x1af   :  { %v268_v57 = vmax.f32 %v264_v54, 0.0 }
 0x1b1   :  { %v269_v58 = vpack.c.bf16 %v268_v57, %v267_v56 }
 0x1b3   :  { %662 = vmatmul.mubr.bf16.vlgmr.msra.gmra.mxu0 %v269_v58  ;;  %682 = vmatmul.mubr.bf16.vlgmr.msra.gmra.mxu1 %v269_v58 }
 0x1ea   :  { %v144_v59 = vpop.xlane.xlu1 %143 }
 0x1eb   :  { %v685_v60 = vtrunc.f32 %v144_v59 }
 0x1ed   :  { %v686_v61 = vcvt.f32.s32 %v685_v60 }
 0x1ee   :  { %v146_v62 = vpop.xlane.xlu1 %145 }
 0x1ef   :  { %150 = vst.msk [vmem:[%s1001_s8] sm:$0xff] %vm149_vm8, %v686_v61  ;;  %v687_v63 = vtrunc.f32 %v146_v62 }
 0x1f1   :  { %v688_v0 = vcvt.f32.s32 %v687_v63 }
 0x1f3   :  { %151 = vst.msk [vmem:[%s1001_s8 + $0x8] sm:$0xff] %vm149_vm8, %v688_v0  ;;  %s728_s8 = scalar_lea.vmem %s511_s29, 128 }
 0x1f4   :  { %p729_p0 = scmp.ne.s32.totalorder %s511_s29, %s728_s8  ;;  %p734_p2 = scmp.lt.s32.totalorder %s728_s8, %s728_s8 }
 0x1f6   :  { %p735_p3 = por %p734_p2, %p733_p1 }
 0x1f8   :  { %p736_p4 = pnand %p735_p3, %p729_p0 }
 0x273   :  { %v368_v1 = vpop.f32.mrf.mxu0  ;;  %v484_v2 = vpop.f32.mrf.mxu1 }
 0x274   :  { %v577_v3 = vpack.c.bf16 %v368_v1, %v368_v1  ;;  %v579_v4 = vpack.c.bf16 %v484_v2, %v484_v2 }
 0x275   :  { %v663_v5 = vpop.f32.mrf.mxu0  ;;  %v683_v6 = vpop.f32.mrf.mxu1 }
 0x276   :  { %384 = vst.msk [vmem:[#allocation2] sm:$0xf] %vm383_vm9, %v577_v3  ;;  %499 = vst.msk [vmem:[#allocation4] sm:$0xf] %vm383_vm9, %v579_v4 }
 0x277   :  { %v371_v7 = vpop.f32.mrf.mxu0  ;;  %v487_v8 = vpop.f32.mrf.mxu1 }
 0x278   :  { %v578_v9 = vpack.c.bf16 %v371_v7, %v371_v7  ;;  %v580_v10 = vpack.c.bf16 %v487_v8, %v487_v8 }
 0x279   :  { %v664_v11 = vpop.f32.mrf.mxu0  ;;  %v684_v12 = vpop.f32.mrf.mxu1 }
 0x27a   :  { %385 = vst.msk [vmem:[#allocation2 + $0x4] sm:$0xf] %vm383_vm9, %v578_v9  ;;  %500 = vst.msk [vmem:[#allocation4 + $0x4] sm:$0xf] %vm383_vm9, %v580_v10 }
 0x27b   :  { %739 = shalt.err (!%p736_p4)
}
 0x27c   :  { %s776_s12 = smov 64   ;;  %s777_s13 = smov 4  }
 0x27d   :  { %516 = dma.vmem_to_hbm [thread:$0]  %s511_s29, 128, %s1002_s9, [#allocation3], %s776_s12, %s776_s12, %s777_s13  }
 0x27e   :  { %s748_s16 = scalar_lea.vmem %s523_s11, 128  ;;  %p753_p6 = scmp.lt.s32.totalorder %s523_s11, %s523_s11 }
 0x27f   :  { %p749_p5 = scmp.ne.s32.totalorder %s523_s11, %s748_s16  ;;  %p754_p7 = scmp.lt.s32.totalorder %s748_s16, %s748_s16 }
 0x281   :  { %p755_p8 = por %p754_p7, %p753_p6 }
 0x283   :  { %p756_p9 = pnand %p755_p8, %p749_p5 }
 0x285   :  { %759 = shalt.err (!%p756_p9)
}
 0x286   :  { %528 = dma.vmem_to_hbm [thread:$0]  %s523_s11, 128, %s1003_s10, [#allocation5], %s776_s12, %s776_s12, %s777_s13  }
 0x287   :  { %768 = dma.done.wait [#allocation3], 128  }
 0x288   :  { %769 = vsyncadd [#allocation3], 4294967168 }
 0x289   :  { %770 = dma.done.wait [#allocation5], 128  }
 0x28a   :  { %771 = vsyncadd [#allocation5], 4294967168 }
 0x28b   :  { %539 = vsyncpa [#allocation3], 1 }
 0x28c   :  { %540 = vsyncpa [#allocation5], 1 }

</bundles_post_ra>
